<compile_context>
chip_gen: v6e
topology: v6e:2x2x1
jax: 0.10.0
libtpu: 0.0.40
codegen_flags: <defaults>
</compile_context>

<pallas_src>
import functools

import jax
import jax.numpy as jnp
from jax.experimental import pallas as pl
from jax.experimental.pallas import tpu as pltpu

GAMMA = 2


def _round_up(x, m):
    return (x + m - 1) // m * m


def _focal_block(x, t, gamma):
    """x: (C, TB) f32 logits (classes on sublanes, batch on lanes);
    t: (1, TB) int32 targets.  Returns per-sample focal loss, shape (1, TB)."""
    # Numerically-stable logsumexp over the class (sublane) axis.
    m = jnp.max(x, axis=0, keepdims=True)             # (1, TB)
    xm = x - m
    e = jnp.exp(xm)                                   # (C, TB) full-lane EUP work
    sumexp = jnp.sum(e, axis=0, keepdims=True)        # (1, TB)

    # One-hot "gather" of the target class (no dynamic gather on TPU): sublane
    # iota vs. the lane-broadcast targets; the mask is reused for x[t] and
    # exp(x[t]) so no second exp pass is needed for pt.
    cls = jax.lax.broadcasted_iota(jnp.int32, x.shape, 0)
    onehot = cls == t
    tgt_xm = jnp.sum(jnp.where(onehot, xm, 0.0), axis=0, keepdims=True)   # x[t]-m
    tgt_e = jnp.sum(jnp.where(onehot, e, 0.0), axis=0, keepdims=True)     # exp(x[t]-m)

    ce = jnp.maximum(jnp.log(sumexp) - tgt_xm, 0.0)   # per-sample CE, clamp >= 0
    pt = tgt_e / sumexp                               # == exp(-ce), fused
    omp = 1.0 - pt
    if gamma == 2:
        w = omp * omp                                 # avoid pow -> log+exp on EUP
    else:
        w = jnp.power(jnp.maximum(omp, 0.0), jnp.float32(gamma))
    return w * ce                                     # (1, TB)


def _focal_sum_kernel(logits_ref, targets_ref, out_ref, *, gamma, n_valid,
                      block_n, needs_mask):
    focal = _focal_block(logits_ref[...].astype(jnp.float32),
                         targets_ref[...], gamma)
    if needs_mask:
        # Only emitted when the batch is actually padded (static decision).
        col = (jax.lax.broadcasted_iota(jnp.int32, focal.shape, 1)
               + pl.program_id(0) * block_n)
        focal = jnp.where(col < n_valid, focal, 0.0)
    # One cross-lane reduce per (large) tile -> scalar partial for this block.
    out_ref[...] = jnp.reshape(jnp.sum(focal), (1, 1, 1))


def _focal_none_kernel(logits_ref, targets_ref, out_ref, *, gamma):
    # Per-sample output, lane-dense (width = batch tile) -> unmasked stores.
    out_ref[...] = _focal_block(logits_ref[...].astype(jnp.float32),
                                targets_ref[...], gamma)


def focal_loss(logits, targets, *, gamma=GAMMA, reduction="mean", block_n=16384):
    """logits: f32/bf16 [N, C]; targets: int [N].

    reduction='mean'/'sum' -> scalar f32; reduction='none' -> f32 [N]."""
    n, c = logits.shape

    # Batch tile: large enough to amortize per-grid-step overhead, never larger
    # than the (128-padded) batch, always a multiple of 128 lanes.
    n_pad128 = _round_up(n, 128)
    tb = _round_up(min(block_n, n_pad128), 128)
    n_pad = _round_up(n, tb)
    num_blocks = n_pad // tb

    # Lane-major relayout: batch on the lane axis, classes on the sublane axis.
    # (bf16 logits are accepted; the kernel upcasts to f32 after the load.)
    logits_t = jnp.transpose(logits)                        # (C, N)
    targets_row = targets.astype(jnp.int32).reshape(1, n)   # (1, N)
    if n_pad != n:
        logits_t = jnp.pad(logits_t, ((0, 0), (0, n_pad - n)))
        targets_row = jnp.pad(targets_row, ((0, 0), (0, n_pad - n)))

    in_specs = [
        pl.BlockSpec((c, tb), lambda i: (0, i)),
        pl.BlockSpec((1, tb), lambda i: (0, i)),
    ]
    compiler_params = pltpu.CompilerParams(
        # Independent batch tiles -> megacore-shardable on v7x; plain sequential
        # loop on v5e/v6e.  VMEM use per step is tiny (a few MB even at tb=16K).
        dimension_semantics=("parallel",),
        vmem_limit_bytes=32 * 1024 * 1024,
    )

    if reduction in ("mean", "sum"):
        kernel = functools.partial(
            _focal_sum_kernel, gamma=gamma, n_valid=n, block_n=tb,
            needs_mask=(n_pad != n))
        partials = pl.pallas_call(
            kernel,
            out_shape=jax.ShapeDtypeStruct((num_blocks, 1, 1), jnp.float32),
            grid_spec=pltpu.PrefetchScalarGridSpec(
                num_scalar_prefetch=0,
                grid=(num_blocks,),
                in_specs=in_specs,
                out_specs=pl.BlockSpec((1, 1, 1), lambda i: (i, 0, 0)),
            ),
            compiler_params=compiler_params,
        )(logits_t, targets_row)
        total = jnp.sum(partials)
        if reduction == "mean":
            return total / jnp.float32(n)
        return total

    if reduction == "none":
        kernel = functools.partial(_focal_none_kernel, gamma=gamma)
        focal = pl.pallas_call(
            kernel,
            out_shape=jax.ShapeDtypeStruct((1, n_pad), jnp.float32),
            grid_spec=pltpu.PrefetchScalarGridSpec(
                num_scalar_prefetch=0,
                grid=(num_blocks,),
                in_specs=in_specs,
                out_specs=pl.BlockSpec((1, tb), lambda i: (0, i)),
            ),
            compiler_params=compiler_params,
        )(logits_t, targets_row)
        return focal.reshape(n_pad)[:n]

    raise NotImplementedError(f"unsupported reduction: {reduction!r}")


def _reference_focal_loss(logits, targets, gamma=GAMMA, reduction="mean"):
    # pure-JAX reference for sanity checking
    logp = jax.nn.log_softmax(logits.astype(jnp.float32), axis=-1)
    ce = -jnp.take_along_axis(logp, targets[:, None].astype(jnp.int32), axis=-1)[:, 0]
    pt = jnp.exp(-ce)
    fl = (1.0 - pt) ** gamma * ce
    if reduction == "mean":
        return jnp.mean(fl)
    if reduction == "sum":
        return jnp.sum(fl)
    return fl


if __name__ == "__main__":
    key = jax.random.PRNGKey(0)
    k1, k2, k3, k4 = jax.random.split(key, 4)

    # Primary small test: CIFAR-10 style, 10 classes, batch 8.
    N, C = 8, 10
    logits = jax.random.normal(k1, (N, C), dtype=jnp.float32)
    targets = jax.random.randint(k2, (N,), 0, C, dtype=jnp.int32)

    loss = focal_loss(logits, targets)
    jax.block_until_ready(loss)
    ref = _reference_focal_loss(logits, targets)
    assert jnp.allclose(loss, ref, rtol=1e-5, atol=1e-6), (loss, ref)

    # reduction='none' per-sample path on the same small inputs.
    loss_none = focal_loss(logits, targets, reduction="none")
    jax.block_until_ready(loss_none)
    ref_none = _reference_focal_loss(logits, targets, reduction="none")
    assert jnp.allclose(loss_none, ref_none, rtol=1e-5, atol=1e-6)

    # Secondary test: non-multiple batch size -> exercises multi-block grid
    # (with a small block), the padded-tail mask, and per-block partials.
    N2 = 4500
    logits2 = jax.random.normal(k3, (N2, C), dtype=jnp.float32)
    targets2 = jax.random.randint(k4, (N2,), 0, C, dtype=jnp.int32)

    loss2 = focal_loss(logits2, targets2, block_n=2048)
    jax.block_until_ready(loss2)
    ref2 = _reference_focal_loss(logits2, targets2)
    assert jnp.allclose(loss2, ref2, rtol=1e-5, atol=1e-6), (loss2, ref2)

    print("KERNEL_OK")
</pallas_src>

<mosaic_0001>
module attributes {stable_mosaic.version = 11 : i64} {
  func.func @_focal_sum_kernel(%arg0: i32, %arg1: memref<10x128xf32, #tpu.memory_space<vmem>>, %arg2: memref<1x128xi32, #tpu.memory_space<vmem>>, %arg3: memref<1x1x1xf32, #tpu.memory_space<vmem>>) attributes {dimension_semantics = [#tpu.dimension_semantics<parallel>], iteration_bounds = array<i64: 1>, scalar_prefetch = 0 : i64, scratch_operands = 0 : i64, tpu.core_type = #tpu.core_type<tc>, window_params = [{transform_indices = @transform_0, window_bounds = array<i64: 10, 128>}, {transform_indices = @transform_1, window_bounds = array<i64: 1, 128>}, {transform_indices = @transform_2, window_bounds = array<i64: 1, 1, 1>}]} {
    %c0 = arith.constant 0 : index
    %c0_0 = arith.constant 0 : index
    %0 = vector.load %arg1[%c0, %c0_0] : memref<10x128xf32, #tpu.memory_space<vmem>>, vector<10x128xf32>
    %c0_1 = arith.constant 0 : index
    %c0_2 = arith.constant 0 : index
    %1 = vector.load %arg2[%c0_1, %c0_2] : memref<1x128xi32, #tpu.memory_space<vmem>>, vector<1x128xi32>
    %cst = arith.constant dense<0xFF800000> : vector<128xf32>
    %2 = vector.multi_reduction <maximumf>, %0, %cst [0] : vector<10x128xf32> to vector<128xf32>
    %3 = vector.shape_cast %2 : vector<128xf32> to vector<1x128xf32>
    %4 = vector.broadcast %3 : vector<1x128xf32> to vector<10x128xf32>
    %5 = arith.subf %0, %4 : vector<10x128xf32>
    %6 = math.exp %5 : vector<10x128xf32>
    %cst_3 = arith.constant dense<0.000000e+00> : vector<128xf32>
    %7 = vector.multi_reduction <add>, %6, %cst_3 [0] : vector<10x128xf32> to vector<128xf32>
    %8 = vector.shape_cast %7 : vector<128xf32> to vector<1x128xf32>
    %9 = tpu.iota {dimensions = array<i32: 0>} : vector<10x128xi32>
    %10 = vector.broadcast %1 : vector<1x128xi32> to vector<10x128xi32>
    %11 = arith.cmpi eq, %9, %10 : vector<10x128xi32>
    %cst_4 = arith.constant 0.000000e+00 : f32
    %12 = vector.broadcast %cst_4 : f32 to vector<10x128xf32>
    %13 = arith.select %11, %5, %12 : vector<10x128xi1>, vector<10x128xf32>
    %cst_5 = arith.constant dense<0.000000e+00> : vector<128xf32>
    %14 = vector.multi_reduction <add>, %13, %cst_5 [0] : vector<10x128xf32> to vector<128xf32>
    %15 = vector.shape_cast %14 : vector<128xf32> to vector<1x128xf32>
    %cst_6 = arith.constant 0.000000e+00 : f32
    %16 = vector.broadcast %cst_6 : f32 to vector<10x128xf32>
    %17 = arith.select %11, %6, %16 : vector<10x128xi1>, vector<10x128xf32>
    %cst_7 = arith.constant dense<0.000000e+00> : vector<128xf32>
    %18 = vector.multi_reduction <add>, %17, %cst_7 [0] : vector<10x128xf32> to vector<128xf32>
    %19 = vector.shape_cast %18 : vector<128xf32> to vector<1x128xf32>
    %20 = math.log %8 : vector<1x128xf32>
    %21 = arith.subf %20, %15 : vector<1x128xf32>
    %cst_8 = arith.constant 0.000000e+00 : f32
    %22 = vector.broadcast %cst_8 : f32 to vector<1x128xf32>
    %23 = arith.maximumf %21, %22 : vector<1x128xf32>
    %24 = arith.divf %19, %8 : vector<1x128xf32>
    %cst_9 = arith.constant 1.000000e+00 : f32
    %25 = vector.broadcast %cst_9 : f32 to vector<1x128xf32>
    %26 = arith.subf %25, %24 : vector<1x128xf32>
    %27 = arith.mulf %26, %26 : vector<1x128xf32>
    %28 = arith.mulf %27, %23 : vector<1x128xf32>
    %29 = tpu.iota {dimensions = array<i32: 1>} : vector<1x128xi32>
    %c128_i32 = arith.constant 128 : i32
    %30 = arith.muli %arg0, %c128_i32 : i32
    %31 = vector.broadcast %30 : i32 to vector<1x128xi32>
    %32 = arith.addi %29, %31 : vector<1x128xi32>
    %c8_i32 = arith.constant 8 : i32
    %33 = vector.broadcast %c8_i32 : i32 to vector<1x128xi32>
    %34 = arith.cmpi slt, %32, %33 : vector<1x128xi32>
    %cst_10 = arith.constant 0.000000e+00 : f32
    %35 = vector.broadcast %cst_10 : f32 to vector<1x128xf32>
    %36 = arith.select %34, %28, %35 : vector<1x128xi1>, vector<1x128xf32>
    %37 = vector.shape_cast %36 : vector<1x128xf32> to vector<1x1x128xf32>
    %cst_11 = arith.constant dense<0.000000e+00> : vector<1xf32>
    %38 = vector.multi_reduction <add>, %37, %cst_11 [1, 2] : vector<1x1x128xf32> to vector<1xf32>
    %39 = vector.shape_cast %38 : vector<1xf32> to vector<1x1x1xf32>
    %40 = vector.extract %39[0, 0, 0] : f32 from vector<1x1x1xf32>
    %41 = vector.broadcast %40 : f32 to vector<1x1x1xf32>
    %c0_12 = arith.constant 0 : index
    %c0_13 = arith.constant 0 : index
    %c0_14 = arith.constant 0 : index
    %42 = vector.load %arg3[%c0_12, %c0_13, %c0_14] : memref<1x1x1xf32, #tpu.memory_space<vmem>>, vector<1x1x1xf32>
    tpu.vector_store %arg3[%c0_12, %c0_13, %c0_14], %41 {strides = array<i32>} : memref<1x1x1xf32, #tpu.memory_space<vmem>>, vector<1x1x1xf32>,
    return
  }
  func.func @transform_0(%arg0: i32) -> (i32, i32) {
    %c0_i32 = arith.constant 0 : i32
    %c0_i32_0 = arith.constant 0 : i32
    return %c0_i32, %arg0 : i32, i32
  }
  func.func @transform_1(%arg0: i32) -> (i32, i32) {
    %c0_i32 = arith.constant 0 : i32
    %c0_i32_0 = arith.constant 0 : i32
    return %c0_i32, %arg0 : i32, i32
  }
  func.func @transform_2(%arg0: i32) -> (i32, i32, i32) {
    %c0_i32 = arith.constant 0 : i32
    %c0_i32_0 = arith.constant 0 : i32
    %c0_i32_1 = arith.constant 0 : i32
    return %arg0, %c0_i32, %c0_i32_0 : i32, i32, i32
  }
}

</mosaic_0001>

<bundles_post_ra>
// kernel: tpu_custom_call.1
= control target key start
LH: loop header
LB: loop body
LE: loop exit
PB: predicated region body
PF: predicated region fallthrough
CT: control target
= control target key end

     0   :  { %7 = vsyncpa [#allocation3], 0  ;;  %s217_s0 = inlined_call_operand.hbm [shape: f32[10,128], index: 0, kind: input, shape index: {}]   ;;  %s218_s1 = inlined_call_operand.vmem [shape: s32[1,128], index: 1, kind: input, shape index: {}]   ;;  %s219_s2 = inlined_call_operand.hbm [shape: f32[1,1,1], index: 2, kind: output, shape index: {}]  }
   0x1   :  { %8 = vsyncpa [#allocation4], 0  ;;  %s185_s9 = smov [#allocation2]  }
   0x2   :  { %s14_s10 = sshll.u32 %s185_s9, 4  ;;  %s15_s10 = int_to_ptr.vmem [resolvable:$true] %s14_s10 }
   0x3   :  { %s149_s11 = scalar_lea.vmem %s15_s10, 256  ;;  %p154_p1 = scmp.lt.s32.totalorder %s15_s10, %s15_s10 }
   0x4   :  { %p150_p0 = scmp.ne.s32.totalorder %s15_s10, %s149_s11  ;;  %p155_p2 = scmp.lt.s32.totalorder %s149_s11, %s149_s11 }
   0x6   :  { %p156_p3 = por %p155_p2, %p154_p1 }
   0x8   :  { %p157_p4 = pnand %p156_p3, %p150_p0 }
   0xa   :  { %160 = shalt.err (!%p157_p4)
}
   0xb   :  { %s186_s12 = smov 128   ;;  %s187_s13 = smov 8  }
   0xc   :  { %20 = dma.hbm_to_vmem [thread:$0]  %s217_s0, 256, %s15_s10, [#allocation3], %s186_s12, %s186_s12, %s187_s13  }
   0xd   :  { %181 = dma.done.wait [#allocation3], 256  }
   0xe   :  { %182 = vsyncadd [#allocation3], 4294967040  ;;  %vm29_vm0 = vcmask 1041408   ;;  %v26_v0 = vld [vmem:[#allocation2] sm:$0xff]  ;;  %v27_v1 = vld [vmem:[#allocation2 + $0x8] sm:$0x3]  ;;  %v52_v14 = vlaneseq }
   0xf   :  { %v30_v2 = vsel %vm29_vm0, %v27_v1, -inf  ;;  %v126_v17 = vld [vmem:[%s218_s1] ss:$0 sm:$0xff]  ;;  %vm97_vm4 = vcmask 1040384   ;;  %s188_s1 = smov [#allocation5]   ;;  %vm109_vm5 = vcmask 0  }
  0x10   :  { %v31_v3 = vmax.f32 %v26_v0, %v30_v2  ;;  %v53_v15 = vshrl.u32 %v52_v14, 7  ;;  %v91_v53 = vand.u32 127, %v52_v14  ;;  %s117_s17 = sshll.u32 %s188_s1, 4  ;;  %s118_s17 = int_to_ptr.vmem [resolvable:$true] %s117_s17 }
  0x11   :  { %s161_s19 = scalar_lea.vmem %s118_s17, 16  ;;  %s165_s20 = scalar_lea.vmem %s118_s17, 32 }
  0x12   :  { %v32_v4 = vrot.slane %v31_v3, 4  ;;  %v54_v16 = vadd.s32 8, %v53_v15  ;;  %vm59_vm1 = vcmp.eq.s32.totalorder %v53_v15, %v126_v17  ;;  %vm95_vm3 = vcmp.lt.s32.totalorder %v91_v53, 8  ;;  %p162_p5 = scmp.ne.s32.totalorder %s118_s17, %s161_s19  ;;  %p166_p6 = scmp.lt.s32.totalorder %s118_s17, %s118_s17 }
  0x13   :  { %p167_p7 = scmp.lt.s32.totalorder %s165_s20, %s161_s19 }
  0x14   :  { %v33_v5 = vmax.f32 %v31_v3, %v32_v4  ;;  %vm60_vm2 = vcmp.eq.s32.totalorder %v54_v16, %v126_v17 }
  0x15   :  { %p168_p8 = por %p167_p7, %p166_p6 }
  0x16   :  { %v34_v6 = vrot.slane %v33_v5, 2 }
  0x17   :  { %p169_p9 = pnand %p168_p8, %p162_p5 }
  0x18   :  { %v35_v7 = vmax.f32 %v33_v5, %v34_v6 }
  0x1a   :  { %v36_v8 = vrot.slane %v35_v7, 1 }
  0x1c   :  { %v37_v9 = vmax.f32 %v35_v7, %v36_v8 }
  0x1e   :  { %v38_v10 = vsub.f32 %v26_v0, %v37_v9  ;;  %v39_v11 = vsub.f32 %v27_v1, %v37_v9 }
  0x20   :  { %v40_v12 = vmul.f32 1.442695, %v38_v10  ;;  %v42_v13 = vmul.f32 1.442695, %v39_v11  ;;  %v62_v18 = vsel %vm60_vm2, %v39_v11, 0.0  ;;  %v61_v23 = vsel %vm59_vm1, %v38_v10, 0.0 }
  0x21   :  { %v63_v24 = vsel %vm29_vm0, %v62_v18, 0.0 }
  0x22   :  { %133 = vpow2.f32 %v40_v12  ;;  %v64_v30 = vadd.f32 %v63_v24, %v61_v23 }
  0x23   :  { %135 = vpow2.f32 %v42_v13 }
  0x24   :  { %v65_v34 = vrot.slane %v64_v30, 4 }
  0x26   :  { %v66_v38 = vadd.f32 %v65_v34, %v64_v30 }
  0x28   :  { %v67_v41 = vrot.slane %v66_v38, 2 }
  0x2a   :  { %v68_v43 = vadd.f32 %v67_v41, %v66_v38 }
  0x2c   :  { %v69_v45 = vrot.slane %v68_v43, 1 }
  0x2e   :  { %v70_v47 = vadd.f32 %v69_v45, %v68_v43 }
  0x2f   :  { %v134_v19 = vpop.eup %133 }
  0x30   :  { %v136_v20 = vpop.eup %135  ;;  %v71_v21 = vsel %vm59_vm1, %v134_v19, 0.0 }
  0x31   :  { %v44_v22 = vsel %vm29_vm0, %v136_v20, 0.0  ;;  %v72_v25 = vsel %vm60_vm2, %v136_v20, 0.0 }
  0x32   :  { %v45_v26 = vadd.f32 %v134_v19, %v44_v22  ;;  %v73_v27 = vsel %vm29_vm0, %v72_v25, 0.0 }
  0x33   :  { %v74_v28 = vadd.f32 %v73_v27, %v71_v21 }
  0x34   :  { %v46_v29 = vrot.slane %v45_v26, 4 }
  0x35   :  { %v75_v32 = vrot.slane %v74_v28, 4 }
  0x36   :  { %v47_v31 = vadd.f32 %v46_v29, %v45_v26 }
  0x37   :  { %v76_v36 = vadd.f32 %v75_v32, %v74_v28 }
  0x38   :  { %v48_v33 = vrot.slane %v47_v31, 2 }
  0x39   :  { %v77_v40 = vrot.slane %v76_v36, 2 }
  0x3a   :  { %v49_v35 = vadd.f32 %v48_v33, %v47_v31 }
  0x3b   :  { %v78_v42 = vadd.f32 %v77_v40, %v76_v36 }
  0x3c   :  { %v50_v37 = vrot.slane %v49_v35, 1 }
  0x3d   :  { %v79_v44 = vrot.slane %v78_v42, 1 }
  0x3e   :  { %v51_v39 = vadd.f32 %v50_v37, %v49_v35 }
  0x3f   :  { %v80_v46 = vadd.f32 %v79_v44, %v78_v42 }
  0x40   :  { %137 = vlog2.f32 %v51_v39 }
  0x41   :  { %139 = vrcp.f32 %v51_v39 }
  0x4d   :  { %v138_v48 = vpop.eup %137 }
  0x4e   :  { %v140_v49 = vpop.eup %139  ;;  %v82_v50 = vmul.f32 0.6931472, %v138_v48 }
  0x4f   :  { %v86_v51 = vmul.f32 %v140_v49, %v80_v46 }
  0x50   :  { %v83_v52 = vsub.f32 %v82_v50, %v70_v47 }
  0x51   :  { %v87_v54 = vsub.f32 1.0, %v86_v51 }
  0x52   :  { %v84_v55 = vmax.f32 %v83_v52, 0.0 }
  0x53   :  { %v88_v56 = vmul.f32 %v87_v54, %v87_v54 }
  0x55   :  { %v89_v57 = vmul.f32 %v88_v56, %v84_v55 }
  0x57   :  { %v96_v58 = vsel %vm95_vm3, %v89_v57, 0.0 }
  0x58   :  { %v98_v59 = vsel %vm97_vm4, %v96_v58, 0.0 }
  0x59   :  { %99 = vadd.xlane.f32.xlu0 %v98_v59 }
  0xe2   :  { %v100_v60 = vpop.xlane.xlu0 %99 }
  0xe3   :  { %v101_v61 = vrot.slane %v100_v60, 4 }
  0xe5   :  { %v102_v62 = vadd.f32 %v101_v61, %v100_v60 }
  0xe7   :  { %v103_v63 = vrot.slane %v102_v62, 2 }
  0xe9   :  { %v104_v0 = vadd.f32 %v103_v63, %v102_v62 }
  0xeb   :  { %v105_v1 = vrot.slane %v104_v0, 1 }
  0xed   :  { %v106_v2 = vadd.f32 %v105_v1, %v104_v0 }
  0xef   :  { %127 = vpush %v106_v2 }
 0x120   :  { %s128_s18 = spop %127 }
 0x121   :  { %v108_v3 = vstv %s128_s18 }
 0x122   :  { %110 = vst.msk [vmem:[#allocation5] sm:$0x1] %vm109_vm5, %v108_v3 }
 0x123   :  { %172 = shalt.err (!%p169_p9)
}
 0x124   :  { %120 = dma.vmem_to_hbm [thread:$0]  %s118_s17, 16, %s219_s2, [#allocation4]  }
 0x125   :  { %183 = dma.done.wait [#allocation4], 16  }
 0x126   :  { %184 = vsyncadd [#allocation4], 4294967280 }
 0x127   :  { %124 = vsyncpa [#allocation3], 1 }
 0x128   :  { %125 = vsyncpa [#allocation4], 1 }

</bundles_post_ra>
